<compile_context>
chip_gen: v6e
topology: v6e:2x2x1
jax: 0.10.0
libtpu: 0.0.40
codegen_flags: <defaults>
</compile_context>

<pallas_src>
import functools

import jax
import jax.numpy as jnp
from jax.experimental import pallas as pl
from jax.experimental.pallas import tpu as pltpu

_LANE = 128
_SUBLANE = 8
_NEG_SLOPE = 0.01  # PyTorch LeakyReLU default


def _round_up(x, m):
    return ((x + m - 1) // m) * m


# ----------------------------------------------------------------------------
# Kernel: whole FC stack for one batch tile
# ----------------------------------------------------------------------------
def _fc_stack_kernel(x_ref, w_ref, pb_ref, o_ref, *, acts):
    """Fused forward over all layers for one (tm, D) batch tile.

    x_ref : (tm, D)     bf16  zero-padded input activations
    w_ref : (L, D, D)   bf16  zero-padded, BN-scale-folded weights (x @ W layout)
    pb_ref: (L, 2, D)   f32   [l,0,:] = folded bias, [l,1,:] = BN shift (0 for final)
    o_ref : (tm, D)     f32   zero-padded output of the final layer
    """
    h = x_ref[...]  # bf16
    # Static unroll over the (small) layer stack: activations stay in VMEM/vregs.
    for l, apply_act in enumerate(acts):
        pb = pb_ref[l]                                   # (2, D) f32
        z = jnp.dot(h.astype(jnp.bfloat16), w_ref[l],    # bf16 x bf16 -> MXU
                    preferred_element_type=jnp.float32)
        z = z + pb[0:1, :]                               # bias (BN scale folded in)
        if apply_act:
            z = jnp.where(z >= 0.0, z, _NEG_SLOPE * z)   # LeakyReLU(0.01)
        h = z + pb[1:2, :]                               # BN shift (zeros if no BN)
    o_ref[...] = h.astype(o_ref.dtype)


# ----------------------------------------------------------------------------
# Wrapper
# ----------------------------------------------------------------------------
def fc_forward(h, params):
    """h: (B, d_graph_layer) float32 -> (B, n_tasks) float32."""
    w_stack = params["w_stack"]       # (L, D, D) bf16
    pb_stack = params["pb_stack"]     # (L, 2, D) f32
    acts = params["acts"]
    d_in, d_out = params["d_in"], params["d_out"]
    L, D, _ = w_stack.shape
    B = h.shape[0]

    # Batch tiling: pad batch to a sublane multiple, tile with tm <= 512.
    tm = min(_round_up(B, _SUBLANE), 512)
    B_pad = _round_up(B, tm)
    # Input streamed as bf16 (halves input-tile HBM traffic); zeros in the
    # padded rows/cols keep the padded matmul exact.
    x = (jnp.zeros((B_pad, D), jnp.bfloat16)
         .at[:B, :d_in].set(h.astype(jnp.bfloat16)))

    # VMEM budget sanity (weight stack is kept resident; x/out tiles double-buffered).
    resident_bytes = w_stack.size * 2 + pb_stack.size * 4
    stream_bytes = 2 * tm * D * 2 + 2 * tm * D * 4   # 2x in (bf16) + 2x out (f32)
    assert resident_bytes + stream_bytes < 24 * 1024 * 1024, (
        "FC stack too large for single-kernel VMEM residency"
    )  # TODO(synk): add K/N tiling of the weight stack for very large d_FC_layer

    grid = (B_pad // tm,)
    out = pl.pallas_call(
        functools.partial(_fc_stack_kernel, acts=acts),
        out_shape=jax.ShapeDtypeStruct((B_pad, D), jnp.float32),
        grid=grid,
        in_specs=[
            pl.BlockSpec((tm, D), lambda i: (i, 0)),        # batch tile (bf16)
            pl.BlockSpec((L, D, D), lambda i: (0, 0, 0)),   # weights: VMEM-resident
            pl.BlockSpec((L, 2, D), lambda i: (0, 0, 0)),   # bias/shift: resident
        ],
        out_specs=pl.BlockSpec((tm, D), lambda i: (i, 0)),
        compiler_params=pltpu.CompilerParams(
            dimension_semantics=("parallel",),
            vmem_limit_bytes=32 * 1024 * 1024,  # safe on v5e/v6e/v7x
        ),
    )(x, w_stack, pb_stack)
    return out[:B, :d_out]


# ----------------------------------------------------------------------------
# Parameter construction (replicates FC.__init__) and packing
# ----------------------------------------------------------------------------
def _linear_init(key, fan_in, fan_out):
    """PyTorch nn.Linear default init: U(-1/sqrt(fan_in), 1/sqrt(fan_in))."""
    kw, kb = jax.random.split(key)
    bound = 1.0 / jnp.sqrt(jnp.float32(fan_in))
    # PyTorch stores weight as (fan_out, fan_in); we keep the transposed (fan_in, fan_out).
    w = jax.random.uniform(kw, (fan_in, fan_out), jnp.float32, -bound, bound)
    b = jax.random.uniform(kb, (1, fan_out), jnp.float32, -bound, bound)
    return w, b


def build_fc_params(key, d_graph_layer, d_FC_layer, n_FC_layer, n_tasks):
    """Replicates the FC.__init__ layer list (eval-mode parameters).

    Note: for j==0 (when n_FC_layer>1) BOTH the (d_graph->d_FC) block AND the
    else-branch (d_FC->d_FC) block are appended — this matches the original
    PyTorch module's `if j==0 / if j==n-1 / else` structure exactly.
    """
    eps = 1e-5
    layers = []  # each: (w, b, scale, shift, act)
    bn_scale = 1.0 / jnp.sqrt(1.0 + eps)  # gamma=1, running_var=1
    for j in range(n_FC_layer):
        if j == 0:
            key, sub = jax.random.split(key)
            w, b = _linear_init(sub, d_graph_layer, d_FC_layer)
            layers.append((w, b,
                           jnp.full((1, d_FC_layer), bn_scale, jnp.float32),
                           jnp.zeros((1, d_FC_layer), jnp.float32), True))
        if j == n_FC_layer - 1:
            key, sub = jax.random.split(key)
            w, b = _linear_init(sub, d_FC_layer, n_tasks)
            layers.append((w, b,
                           jnp.ones((1, n_tasks), jnp.float32),
                           jnp.zeros((1, n_tasks), jnp.float32), False))
        else:
            key, sub = jax.random.split(key)
            w, b = _linear_init(sub, d_FC_layer, d_FC_layer)
            layers.append((w, b,
                           jnp.full((1, d_FC_layer), bn_scale, jnp.float32),
                           jnp.zeros((1, d_FC_layer), jnp.float32), True))
    return layers


def pack_fc_params(raw_layers):
    """Pad all layers to a common lane-aligned width D, fold the (positive) BN
    scale into W/b, cast weights to bf16, stack bias/shift into one operand."""
    dims = [raw_layers[0][0].shape[0]] + [w.shape[1] for (w, *_r) in raw_layers]
    D = max(_round_up(d, _LANE) for d in dims)
    L = len(raw_layers)
    w_stack = jnp.zeros((L, D, D), jnp.float32)
    pb_stack = jnp.zeros((L, 2, D), jnp.float32)
    acts = []
    for l, (w, b, scale, shift, act) in enumerate(raw_layers):
        # Fold valid because scale > 0 (default gamma=1, running_var=1).
        assert bool(jnp.all(scale > 0)), "BN scale fold requires scale > 0"
        # TODO(synk): keep scale un-folded in the kernel if a trained gamma can be negative.
        din, dout = w.shape
        w_stack = w_stack.at[l, :din, :dout].set(w * scale)
        pb_stack = pb_stack.at[l, 0, :dout].set((b * scale)[0])
        pb_stack = pb_stack.at[l, 1, :dout].set(shift[0])
        acts.append(bool(act))
    return dict(
        w_stack=w_stack.astype(jnp.bfloat16),
        pb_stack=pb_stack,
        acts=tuple(acts),
        d_in=raw_layers[0][0].shape[0],
        d_out=raw_layers[-1][0].shape[1],
    )


# ----------------------------------------------------------------------------
# References
# ----------------------------------------------------------------------------
def fc_forward_ref(h, raw_layers):
    """Pure-JAX f32 reference of the module semantics (unfolded, unpadded)."""
    x = h
    for (w, b, scale, shift, act) in raw_layers:
        z = x @ w + b
        if act:
            z = jnp.where(z >= 0.0, z, _NEG_SLOPE * z)
        x = z * scale + shift
    return x


def fc_forward_ref_bf16(h, params):
    """Reference matching the kernel's bf16-input / f32-accumulate path exactly."""
    w_stack = params["w_stack"].astype(jnp.float32)
    pb = params["pb_stack"]
    D = w_stack.shape[-1]
    x = jnp.zeros((h.shape[0], D), jnp.float32).at[:, :params["d_in"]].set(h)
    for l, act in enumerate(params["acts"]):
        xb = x.astype(jnp.bfloat16).astype(jnp.float32)
        z = jnp.dot(xb, w_stack[l], precision=jax.lax.Precision.HIGHEST) + pb[l, 0:1, :]
        if act:
            z = jnp.where(z >= 0.0, z, _NEG_SLOPE * z)
        x = z + pb[l, 1:2, :]
    return x[:, :params["d_out"]]


if __name__ == "__main__":
    # Small shapes consistent with the module.
    batch = 8
    d_graph_layer = 32
    d_FC_layer = 32
    n_FC_layer = 2
    n_tasks = 4

    key = jax.random.PRNGKey(0)
    k_in, k_par = jax.random.split(key)
    h = jax.random.normal(k_in, (batch, d_graph_layer), jnp.float32)

    raw_layers = build_fc_params(k_par, d_graph_layer, d_FC_layer, n_FC_layer, n_tasks)
    params = pack_fc_params(raw_layers)

    out = fc_forward(h, params)
    out = jax.block_until_ready(out)
    assert out.shape == (batch, n_tasks)

    # Tight check against a reference that mimics the kernel's bf16/f32 math.
    ref_tight = fc_forward_ref_bf16(h, params)
    assert jnp.allclose(out, ref_tight, atol=1e-4, rtol=1e-4), (
        float(jnp.max(jnp.abs(out - ref_tight))))

    # Loose semantic check against the full-f32, unfolded module reference
    # (difference is only bf16 weight/activation rounding).
    ref_math = fc_forward_ref(h, raw_layers)
    assert jnp.allclose(out, ref_math, atol=2e-2, rtol=2e-2), (
        float(jnp.max(jnp.abs(out - ref_math))))

    print("KERNEL_OK")
</pallas_src>

<mosaic_0001>
module attributes {stable_mosaic.version = 11 : i64} {
  func.func @_fc_stack_kernel(%arg0: i32, %arg1: memref<8x128xbf16, #tpu.memory_space<vmem>>, %arg2: memref<3x128x128xbf16, #tpu.memory_space<vmem>>, %arg3: memref<3x2x128xf32, #tpu.memory_space<vmem>>, %arg4: memref<8x128xf32, #tpu.memory_space<vmem>>) attributes {dimension_semantics = [#tpu.dimension_semantics<parallel>], iteration_bounds = array<i64: 1>, scalar_prefetch = 0 : i64, scratch_operands = 0 : i64, tpu.core_type = #tpu.core_type<tc>, window_params = [{transform_indices = @transform_0, window_bounds = array<i64: 8, 128>}, {pipeline_mode = #tpu.pipeline_mode<synchronous>, transform_indices = @transform_1, window_bounds = array<i64: 3, 128, 128>}, {pipeline_mode = #tpu.pipeline_mode<synchronous>, transform_indices = @transform_2, window_bounds = array<i64: 3, 2, 128>}, {transform_indices = @transform_3, window_bounds = array<i64: 8, 128>}]} {
    %c0 = arith.constant 0 : index
    %c0_0 = arith.constant 0 : index
    %0 = vector.load %arg1[%c0, %c0_0] : memref<8x128xbf16, #tpu.memory_space<vmem>>, vector<8x128xbf16>
    %c0_1 = arith.constant 0 : index
    %c0_2 = arith.constant 0 : index
    %c0_3 = arith.constant 0 : index
    %1 = vector.load %arg3[%c0_1, %c0_2, %c0_3] : memref<3x2x128xf32, #tpu.memory_space<vmem>>, vector<1x2x128xf32>
    %2 = vector.shape_cast %1 : vector<1x2x128xf32> to vector<2x128xf32>
    %c0_4 = arith.constant 0 : index
    %c0_5 = arith.constant 0 : index
    %c0_6 = arith.constant 0 : index
    %3 = vector.load %arg2[%c0_4, %c0_5, %c0_6] : memref<3x128x128xbf16, #tpu.memory_space<vmem>>, vector<1x128x128xbf16>
    %4 = vector.shape_cast %3 : vector<1x128x128xbf16> to vector<128x128xbf16>
    %cst = arith.constant dense<0.000000e+00> : vector<8x128xf32>
    %5 = tpu.matmul %0, %4, %cst {dimension_numbers = #tpu.dot_dimension_numbers<[1], [0], [0], [1], [0, 0, 1, 1], [], []>} : vector<8x128xbf16>, vector<128x128xbf16>, vector<8x128xf32> -> vector<8x128xf32>
    %6 = vector.extract_strided_slice %2 {offsets = [0, 0], sizes = [1, 128], strides = [1, 1]} : vector<2x128xf32> to vector<1x128xf32>
    %7 = vector.broadcast %6 : vector<1x128xf32> to vector<8x128xf32>
    %8 = arith.addf %5, %7 : vector<8x128xf32>
    %cst_7 = arith.constant 0.000000e+00 : f32
    %9 = vector.broadcast %cst_7 : f32 to vector<8x128xf32>
    %10 = arith.cmpf oge, %8, %9 : vector<8x128xf32>
    %cst_8 = arith.constant 0.00999999977 : f32
    %11 = vector.broadcast %cst_8 : f32 to vector<8x128xf32>
    %12 = arith.mulf %11, %8 : vector<8x128xf32>
    %13 = arith.select %10, %8, %12 : vector<8x128xi1>, vector<8x128xf32>
    %14 = vector.extract_strided_slice %2 {offsets = [1, 0], sizes = [1, 128], strides = [1, 1]} : vector<2x128xf32> to vector<1x128xf32>
    %15 = vector.broadcast %14 : vector<1x128xf32> to vector<8x128xf32>
    %16 = arith.addf %13, %15 : vector<8x128xf32>
    %c1 = arith.constant 1 : index
    %c0_9 = arith.constant 0 : index
    %c0_10 = arith.constant 0 : index
    %17 = vector.load %arg3[%c1, %c0_9, %c0_10] : memref<3x2x128xf32, #tpu.memory_space<vmem>>, vector<1x2x128xf32>
    %18 = vector.shape_cast %17 : vector<1x2x128xf32> to vector<2x128xf32>
    %19 = arith.truncf %16 : vector<8x128xf32> to vector<8x128xbf16>
    %c1_11 = arith.constant 1 : index
    %c0_12 = arith.constant 0 : index
    %c0_13 = arith.constant 0 : index
    %20 = vector.load %arg2[%c1_11, %c0_12, %c0_13] : memref<3x128x128xbf16, #tpu.memory_space<vmem>>, vector<1x128x128xbf16>
    %21 = vector.shape_cast %20 : vector<1x128x128xbf16> to vector<128x128xbf16>
    %cst_14 = arith.constant dense<0.000000e+00> : vector<8x128xf32>
    %22 = tpu.matmul %19, %21, %cst_14 {dimension_numbers = #tpu.dot_dimension_numbers<[1], [0], [0], [1], [0, 0, 1, 1], [], []>} : vector<8x128xbf16>, vector<128x128xbf16>, vector<8x128xf32> -> vector<8x128xf32>
    %23 = vector.extract_strided_slice %18 {offsets = [0, 0], sizes = [1, 128], strides = [1, 1]} : vector<2x128xf32> to vector<1x128xf32>
    %24 = vector.broadcast %23 : vector<1x128xf32> to vector<8x128xf32>
    %25 = arith.addf %22, %24 : vector<8x128xf32>
    %cst_15 = arith.constant 0.000000e+00 : f32
    %26 = vector.broadcast %cst_15 : f32 to vector<8x128xf32>
    %27 = arith.cmpf oge, %25, %26 : vector<8x128xf32>
    %cst_16 = arith.constant 0.00999999977 : f32
    %28 = vector.broadcast %cst_16 : f32 to vector<8x128xf32>
    %29 = arith.mulf %28, %25 : vector<8x128xf32>
    %30 = arith.select %27, %25, %29 : vector<8x128xi1>, vector<8x128xf32>
    %31 = vector.extract_strided_slice %18 {offsets = [1, 0], sizes = [1, 128], strides = [1, 1]} : vector<2x128xf32> to vector<1x128xf32>
    %32 = vector.broadcast %31 : vector<1x128xf32> to vector<8x128xf32>
    %33 = arith.addf %30, %32 : vector<8x128xf32>
    %c2 = arith.constant 2 : index
    %c0_17 = arith.constant 0 : index
    %c0_18 = arith.constant 0 : index
    %34 = vector.load %arg3[%c2, %c0_17, %c0_18] : memref<3x2x128xf32, #tpu.memory_space<vmem>>, vector<1x2x128xf32>
    %35 = vector.shape_cast %34 : vector<1x2x128xf32> to vector<2x128xf32>
    %36 = arith.truncf %33 : vector<8x128xf32> to vector<8x128xbf16>
    %c2_19 = arith.constant 2 : index
    %c0_20 = arith.constant 0 : index
    %c0_21 = arith.constant 0 : index
    %37 = vector.load %arg2[%c2_19, %c0_20, %c0_21] : memref<3x128x128xbf16, #tpu.memory_space<vmem>>, vector<1x128x128xbf16>
    %38 = vector.shape_cast %37 : vector<1x128x128xbf16> to vector<128x128xbf16>
    %cst_22 = arith.constant dense<0.000000e+00> : vector<8x128xf32>
    %39 = tpu.matmul %36, %38, %cst_22 {dimension_numbers = #tpu.dot_dimension_numbers<[1], [0], [0], [1], [0, 0, 1, 1], [], []>} : vector<8x128xbf16>, vector<128x128xbf16>, vector<8x128xf32> -> vector<8x128xf32>
    %40 = vector.extract_strided_slice %35 {offsets = [0, 0], sizes = [1, 128], strides = [1, 1]} : vector<2x128xf32> to vector<1x128xf32>
    %41 = vector.broadcast %40 : vector<1x128xf32> to vector<8x128xf32>
    %42 = arith.addf %39, %41 : vector<8x128xf32>
    %43 = vector.extract_strided_slice %35 {offsets = [1, 0], sizes = [1, 128], strides = [1, 1]} : vector<2x128xf32> to vector<1x128xf32>
    %44 = vector.broadcast %43 : vector<1x128xf32> to vector<8x128xf32>
    %45 = arith.addf %42, %44 : vector<8x128xf32>
    %c0_23 = arith.constant 0 : index
    %c0_24 = arith.constant 0 : index
    %46 = vector.load %arg4[%c0_23, %c0_24] : memref<8x128xf32, #tpu.memory_space<vmem>>, vector<8x128xf32>
    tpu.vector_store %arg4[%c0_23, %c0_24], %45 {strides = array<i32>} : memref<8x128xf32, #tpu.memory_space<vmem>>, vector<8x128xf32>,
    return
  }
  func.func @transform_0(%arg0: i32) -> (i32, i32) {
    %c0_i32 = arith.constant 0 : i32
    %c0_i32_0 = arith.constant 0 : i32
    return %arg0, %c0_i32 : i32, i32
  }
  func.func @transform_1(%arg0: i32) -> (i32, i32, i32) {
    %c0_i32 = arith.constant 0 : i32
    %c0_i32_0 = arith.constant 0 : i32
    %c0_i32_1 = arith.constant 0 : i32
    %c0_i32_2 = arith.constant 0 : i32
    return %c0_i32, %c0_i32_0, %c0_i32_1 : i32, i32, i32
  }
  func.func @transform_2(%arg0: i32) -> (i32, i32, i32) {
    %c0_i32 = arith.constant 0 : i32
    %c0_i32_0 = arith.constant 0 : i32
    %c0_i32_1 = arith.constant 0 : i32
    %c0_i32_2 = arith.constant 0 : i32
    return %c0_i32, %c0_i32_0, %c0_i32_1 : i32, i32, i32
  }
  func.func @transform_3(%arg0: i32) -> (i32, i32) {
    %c0_i32 = arith.constant 0 : i32
    %c0_i32_0 = arith.constant 0 : i32
    return %arg0, %c0_i32 : i32, i32
  }
}

</mosaic_0001>

<bundles_post_ra>
// kernel: tpu_custom_call.1
= control target key start
LH: loop header
LB: loop body
LE: loop exit
PB: predicated region body
PF: predicated region fallthrough
CT: control target
= control target key end

     0   :  { %8 = vsyncpa [#allocation3], 0  ;;  %s730_s0 = inlined_call_operand.hbm [shape: bf16[8,128], index: 0, kind: input, shape index: {}]   ;;  %s731_s1 = inlined_call_operand.hbm [shape: bf16[3,128,128], index: 1, kind: input, shape index: {}]   ;;  %s732_s2 = inlined_call_operand.hbm [shape: f32[3,2,128], index: 2, kind: input, shape index: {}]   ;;  %s733_s3 = inlined_call_operand.hbm [shape: f32[8,128], index: 3, kind: output, shape index: {}]  }
   0x1   :  { %9 = vsyncpa [#allocation6], 0 }
   0x2   :  { %10 = vsyncpa [#allocation4], 0  ;;  %s658_s12 = smov [#allocation5]  }
   0x3   :  { %s26_s13 = sshll.u32 %s658_s12, 4  ;;  %s27_s13 = int_to_ptr.vmem [resolvable:$true] %s26_s13 }
   0x4   :  { %s580_s14 = scalar_lea.vmem %s27_s13, 3072  ;;  %p585_p1 = scmp.lt.s32.totalorder %s27_s13, %s27_s13 }
   0x5   :  { %p581_p0 = scmp.ne.s32.totalorder %s27_s13, %s580_s14  ;;  %p586_p2 = scmp.lt.s32.totalorder %s580_s14, %s580_s14 }
   0x7   :  { %p587_p3 = por %p586_p2, %p585_p1 }
   0x9   :  { %p588_p4 = pnand %p587_p3, %p581_p0 }
   0xb   :  { %591 = shalt.err (!%p588_p4)
}
   0xc   :  { %s659_s15 = smov 64   ;;  %s660_s16 = smov 4  }
   0xd   :  { %32 = dma.hbm_to_vmem [thread:$0]  %s731_s1, 3072, %s27_s13, [#allocation6], %s659_s15, %s659_s15, %s660_s16  }
   0xe   :  { %s661_s19 = smov [#allocation2]   ;;  %s662_s21 = smov [#allocation7]  }
   0xf   :  { %s17_s20 = sshll.u32 %s661_s19, 4  ;;  %s38_s22 = sshll.u32 %s662_s21, 4  ;;  %s18_s20 = int_to_ptr.vmem [resolvable:$true] %s17_s20  ;;  %s39_s22 = int_to_ptr.vmem [resolvable:$true] %s38_s22 }
  0x10   :  { %s600_s23 = scalar_lea.vmem %s18_s20, 64  ;;  %p605_p6 = scmp.lt.s32.totalorder %s18_s20, %s18_s20 }
  0x11   :  { %p601_p5 = scmp.ne.s32.totalorder %s18_s20, %s600_s23  ;;  %p606_p7 = scmp.lt.s32.totalorder %s600_s23, %s600_s23 }
  0x13   :  { %p607_p8 = por %p606_p7, %p605_p6 }
  0x15   :  { %p608_p9 = pnand %p607_p8, %p601_p5 }
  0x17   :  { %611 = shalt.err (!%p608_p9)
}
  0x18   :  { %20 = dma.hbm_to_vmem [thread:$0]  %s730_s0, 64, %s18_s20, [#allocation3]  }
  0x19   :  { %s620_s26 = scalar_lea.vmem %s39_s22, 96  ;;  %p625_p11 = scmp.lt.s32.totalorder %s39_s22, %s39_s22 }
  0x1a   :  { %p621_p10 = scmp.ne.s32.totalorder %s39_s22, %s620_s26  ;;  %p626_p12 = scmp.lt.s32.totalorder %s620_s26, %s620_s26 }
  0x1c   :  { %p627_p13 = por %p626_p12, %p625_p11 }
  0x1e   :  { %p628_p0 = pnand %p627_p13, %p621_p10 }
  0x20   :  { %631 = shalt.err (!%p628_p0)
}
  0x21   :  { %s663_s1 = smov 32   ;;  %s664_s27 = smov 2  }
  0x22   :  { %44 = dma.hbm_to_vmem [thread:$0]  %s732_s2, 96, %s39_s22, [#allocation6], %s663_s1, %s663_s1, %s664_s27  }
  0x23   :  { %652 = dma.done.wait [#allocation3], 64  }
  0x24   :  { %653 = vsyncadd [#allocation3], 4294967232 }
  0x25   :  { %654 = dma.done.wait [#allocation6], 3168  }
  0x26   :  { %655 = vsyncadd [#allocation6], 4294964128  ;;  %v665_v0 = vmov 0.0   ;;  %vm666_vm0 = vmmov 0   ;;  %v548_v1 = vld [vmem:[#allocation5 + $0x38] sm:$0xff]   ;;  %v549_v2 = vld [vmem:[#allocation5 + $0x30] sm:$0xff]   ;;  %v73_v24 = vlaneseq }
  0x27   :  { %478 = vmatprep.subr.bf16.mxu0 %v665_v0  ;;  %494 = vmatprep.mubr.msk.bf16.mxu0 %vm666_vm0, %v665_v0  ;;  %v550_v3 = vld [vmem:[#allocation5 + $0x28] sm:$0xff]   ;;  %v556_v4 = vld [vmem:[#allocation5 + $0x78] sm:$0xff]   ;;  %v551_v5 = vld [vmem:[#allocation5 + $0x20] sm:$0xff]   ;;  %s667_s0 = smov [#allocation8]  }
  0x28   :  { %498 = vmatprep.subr.bf16.mxu1 %v665_v0  ;;  %514 = vmatprep.mubr.msk.bf16.mxu1 %vm666_vm0, %v665_v0  ;;  %v557_v6 = vld [vmem:[#allocation5 + $0x70] sm:$0xff]   ;;  %v552_v7 = vld [vmem:[#allocation5 + $0x18] sm:$0xff]   ;;  %v558_v8 = vld [vmem:[#allocation5 + $0x68] sm:$0xff]   ;;  %v74_v25 = vshrl.u32 %v73_v24, 7  ;;  %s417_s2 = sshll.u32 %s667_s0, 4  ;;  %s418_s2 = int_to_ptr.vmem [resolvable:$true] %s417_s2 }
  0x29   :  { %479 = vmatpush3.bf16.msra.mxu0 %v548_v1  ;;  %499 = vmatpush3.bf16.msra.mxu1 %v556_v4  ;;  %v553_v9 = vld [vmem:[#allocation5 + $0x10] sm:$0xff]   ;;  %v559_v10 = vld [vmem:[#allocation5 + $0x60] sm:$0xff]   ;;  %v554_v11 = vld [vmem:[#allocation5 + $0x8] sm:$0xff]   ;;  %s632_s30 = scalar_lea.vmem %s418_s2, 128  ;;  %p637_p2 = scmp.lt.s32.totalorder %s418_s2, %s418_s2 }
  0x2a   :  { %480 = vmatprep.subr.bf16.mxu0 %v665_v0  ;;  %500 = vmatprep.subr.bf16.mxu1 %v665_v0  ;;  %v560_v12 = vld [vmem:[#allocation5 + $0x58] sm:$0xff]   ;;  %v555_v13 = vld [vmem:[#allocation5] sm:$0xff]   ;;  %v561_v14 = vld [vmem:[#allocation5 + $0x50] sm:$0xff]   ;;  %v75_v26 = vsub.s32 0, %v74_v25  ;;  %v170_v29 = vsub.s32 1, %v74_v25  ;;  %p633_p1 = scmp.ne.s32.totalorder %s418_s2, %s632_s30  ;;  %p638_p3 = scmp.lt.s32.totalorder %s632_s30, %s632_s30 }
  0x2b   :  { %v55_v15 = vld [vmem:[#allocation2] sm:$0xf]  ;;  %v562_v16 = vld [vmem:[#allocation5 + $0x48] sm:$0xff]   ;;  %v563_v17 = vld [vmem:[#allocation5 + $0x40] sm:$0xff]  }
  0x2c   :  { %v564_v18 = vld [vmem:[#allocation5 + $0xb8] sm:$0xff]   ;;  %v565_v19 = vld [vmem:[#allocation5 + $0xb0] sm:$0xff]   ;;  %v566_v20 = vld [vmem:[#allocation5 + $0xa8] sm:$0xff]   ;;  %p639_p4 = por %p638_p3, %p637_p2 }
  0x2d   :  { %481 = vmatpush3.bf16.msra.mxu0 %v549_v2  ;;  %501 = vmatpush3.bf16.msra.mxu1 %v557_v6  ;;  %v567_v21 = vld [vmem:[#allocation5 + $0xa0] sm:$0xff]   ;;  %v568_v22 = vld [vmem:[#allocation5 + $0x98] sm:$0xff]   ;;  %v569_v23 = vld [vmem:[#allocation5 + $0x90] sm:$0xff]  }
  0x2e   :  { %482 = vmatprep.subr.bf16.mxu0 %v665_v0  ;;  %502 = vmatprep.subr.bf16.mxu1 %v665_v0  ;;  %v56_v27 = vld [vmem:[#allocation7] sm:$0x3]  ;;  %v570_v40 = vld [vmem:[#allocation5 + $0x88] sm:$0xff]   ;;  %v174_v42 = vld [vmem:[#allocation7 + $0x2] sm:$0x3]  ;;  %p640_p5 = pnand %p639_p4, %p633_p1 }
  0x2f   :  { %v76_v28 = vrot.slane %v56_v27, %v75_v26  ;;  %v171_v32 = vrot.slane %v56_v27, %v170_v29  ;;  %v571_v41 = vld [vmem:[#allocation5 + $0x80] sm:$0xff]   ;;  %v196_v43 = vrot.slane %v174_v42, %v75_v26  ;;  %v291_v46 = vrot.slane %v174_v42, %v170_v29 }
  0x30   :  { %v294_v54 = vld [vmem:[#allocation7 + $0x4] sm:$0x3] }
  0x31   :  { %483 = vmatpush3.bf16.msra.mxu0 %v550_v3  ;;  %503 = vmatpush3.bf16.msra.mxu1 %v558_v8  ;;  %v316_v55 = vrot.slane %v294_v54, %v75_v26  ;;  %v408_v56 = vrot.slane %v294_v54, %v170_v29 }
  0x32   :  { %484 = vmatprep.subr.bf16.mxu0 %v665_v0  ;;  %504 = vmatprep.subr.bf16.mxu1 %v665_v0 }
  0x35   :  { %485 = vmatpush3.bf16.msra.mxu0 %v551_v5  ;;  %505 = vmatpush3.bf16.msra.mxu1 %v559_v10 }
  0x36   :  { %486 = vmatprep.subr.bf16.mxu0 %v665_v0  ;;  %506 = vmatprep.subr.bf16.mxu1 %v665_v0 }
  0x39   :  { %487 = vmatpush3.bf16.msra.mxu0 %v552_v7  ;;  %507 = vmatpush3.bf16.msra.mxu1 %v560_v12 }
  0x3a   :  { %488 = vmatprep.subr.bf16.mxu0 %v665_v0  ;;  %508 = vmatprep.subr.bf16.mxu1 %v665_v0 }
  0x3d   :  { %489 = vmatpush3.bf16.msra.mxu0 %v553_v9  ;;  %509 = vmatpush3.bf16.msra.mxu1 %v561_v14 }
  0x3e   :  { %490 = vmatprep.subr.bf16.mxu0 %v665_v0  ;;  %510 = vmatprep.subr.bf16.mxu1 %v665_v0 }
  0x41   :  { %491 = vmatpush3.bf16.msra.mxu0 %v554_v11  ;;  %511 = vmatpush3.bf16.msra.mxu1 %v562_v16 }
  0x42   :  { %492 = vmatprep.subr.bf16.mxu0 %v665_v0  ;;  %512 = vmatprep.subr.bf16.mxu1 %v665_v0 }
  0x45   :  { %493 = vmatpush3.bf16.msra.mxu0 %v555_v13  ;;  %513 = vmatpush3.bf16.msra.mxu1 %v563_v17 }
  0x46   :  { %518 = vmatprep.subr.bf16.mxu0 %v665_v0 }
  0x48   :  { %495 = vmatmul.mubr.bf16.vlgmr.msra.gmra.mxu0 %v55_v15 }
  0x49   :  { %534 = vmatprep.mubr.msk.bf16.mxu0 %vm666_vm0, %v665_v0  ;;  %519 = vmatpush3.bf16.msra.mxu0 %v564_v18 }
  0x4a   :  { %520 = vmatprep.subr.bf16.mxu0 %v665_v0 }
  0x4d   :  { %521 = vmatpush3.bf16.msra.mxu0 %v565_v19 }
  0x4e   :  { %522 = vmatprep.subr.bf16.mxu0 %v665_v0 }
  0x51   :  { %523 = vmatpush3.bf16.msra.mxu0 %v566_v20 }
  0x52   :  { %524 = vmatprep.subr.bf16.mxu0 %v665_v0 }
  0x55   :  { %525 = vmatpush3.bf16.msra.mxu0 %v567_v21 }
  0x56   :  { %526 = vmatprep.subr.bf16.mxu0 %v665_v0 }
  0x59   :  { %527 = vmatpush3.bf16.msra.mxu0 %v568_v22 }
  0x5a   :  { %528 = vmatprep.subr.bf16.mxu0 %v665_v0 }
  0x5d   :  { %529 = vmatpush3.bf16.msra.mxu0 %v569_v23 }
  0x5e   :  { %530 = vmatprep.subr.bf16.mxu0 %v665_v0 }
  0x61   :  { %531 = vmatpush3.bf16.msra.mxu0 %v570_v40 }
  0x62   :  { %532 = vmatprep.subr.bf16.mxu0 %v665_v0 }
  0x65   :  { %533 = vmatpush3.bf16.msra.mxu0 %v571_v41 }
 0x108   :  { %v159_v30 = vpop.f32.mrf.mxu0 }
 0x109   :  { %v160_v31 = vadd.f32 %v159_v30, %v76_v28 }
 0x10a   :  { %v496_v33 = vpop.f32.mrf.mxu0 }
 0x10b   :  { %vm165_vm1 = vcmp.ge.f32.partialorder %v160_v31, 0.0  ;;  %v166_v34 = vmul.f32 0.01, %v160_v31 }
 0x10c   :  { %v162_v35 = vpop.f32.mrf.mxu0 }
 0x10d   :  { %v167_v36 = vsel %vm165_vm1, %v160_v31, %v166_v34 }
 0x10e   :  { %v497_v37 = vpop.f32.mrf.mxu0  ;;  %v172_v38 = vadd.f32 %v171_v32, %v167_v36 }
 0x110   :  { %v175_v39 = vpack.c.bf16 %v172_v38, %v172_v38 }
 0x112   :  { %515 = vmatmul.mubr.bf16.vlgmr.msra.gmra.mxu1 %v175_v39 }
 0x1d2   :  { %v279_v44 = vpop.f32.mrf.mxu1 }
 0x1d3   :  { %v280_v45 = vadd.f32 %v279_v44, %v196_v43 }
 0x1d4   :  { %v516_v47 = vpop.f32.mrf.mxu1 }
 0x1d5   :  { %vm285_vm2 = vcmp.ge.f32.partialorder %v280_v45, 0.0  ;;  %v286_v48 = vmul.f32 0.01, %v280_v45 }
 0x1d6   :  { %v282_v49 = vpop.f32.mrf.mxu1 }
 0x1d7   :  { %v287_v50 = vsel %vm285_vm2, %v280_v45, %v286_v48 }
 0x1d8   :  { %v292_v51 = vadd.f32 %v291_v46, %v287_v50  ;;  %v517_v52 = vpop.f32.mrf.mxu1 }
 0x1da   :  { %v295_v53 = vpack.c.bf16 %v292_v51, %v292_v51 }
 0x1dc   :  { %535 = vmatmul.mubr.bf16.vlgmr.msra.gmra.mxu0 %v295_v53 }
 0x29c   :  { %v399_v57 = vpop.f32.mrf.mxu0 }
 0x29d   :  { %v400_v58 = vadd.f32 %v399_v57, %v316_v55 }
 0x29e   :  { %v536_v59 = vpop.f32.mrf.mxu0 }
 0x29f   :  { %v409_v60 = vadd.f32 %v408_v56, %v400_v58 }
 0x2a0   :  { %v402_v61 = vpop.f32.mrf.mxu0 }
 0x2a1   :  { %410 = vst [vmem:[#allocation8] sm:$0xff] %v409_v60 }
 0x2a2   :  { %v537_v62 = vpop.f32.mrf.mxu0 }
 0x2a3   :  { %643 = shalt.err (!%p640_p5)
}
 0x2a4   :  { %420 = dma.vmem_to_hbm [thread:$0]  %s418_s2, 128, %s733_s3, [#allocation4]  }
 0x2a5   :  { %656 = dma.done.wait [#allocation4], 128  }
 0x2a6   :  { %657 = vsyncadd [#allocation4], 4294967168 }
 0x2a7   :  { %424 = vsyncpa [#allocation3], 1 }
 0x2a8   :  { %425 = vsyncpa [#allocation6], 1 }
 0x2a9   :  { %426 = vsyncpa [#allocation4], 1 }

</bundles_post_ra>
